<compile_context>
chip_gen: v5e
topology: v5e:2x2
jax: 0.10.0
libtpu: 0.0.40
codegen_flags: <defaults>
</compile_context>

<pallas_src>
import math

import jax
import jax.numpy as jnp
from jax.experimental import pallas as pl
from jax.experimental.pallas import tpu as pltpu


# ----------------------------- Pallas kernel -------------------------------

def _classifier_kernel(x2d_ref, xcls_ref, maskbias_ref,
                       wqkv_ref, bqkv_ref, wo_ref, bo_ref,
                       w1_ref, b1_ref, gamma_ref, beta_ref, w2_ref, b2_ref,
                       out_ref):
    """Fused single-layer encoder (CLS row only) + FFN projection head.

    x2d_ref:      (B*S, H) bf16 token embeddings (flattened in the wrapper)
    xcls_ref:     (B, H)   bf16 CLS-token embeddings (for the residual)
    maskbias_ref: (B, 1, S) f32 additive mask bias (0 valid, -1e9 padded)
    wqkv_ref:     (H, 3H) bf16 fused [Wq | Wk | Wv],  bqkv_ref: (1, 3H) f32
    wo_ref:       (H, H) bf16, bo_ref: (1, H) f32
    w1_ref:       (H, H) bf16, b1_ref/gamma_ref/beta_ref: (1, H) f32
    w2_ref:       (H, Cp) bf16 (lane-padded), b2_ref: (1, Cp) f32
    out_ref:      (B, Cp) f32 logits (padded; wrapper slices to num_classes)
    """
    B = maskbias_ref.shape[0]
    S = maskbias_ref.shape[2]
    H = xcls_ref.shape[1]
    scale = 1.0 / math.sqrt(H)

    # ---- fused QKV projection: one wide MXU matmul, f32 accumulation ----
    qkv = jnp.dot(x2d_ref[...], wqkv_ref[...],
                  preferred_element_type=jnp.float32) + bqkv_ref[...]  # (B*S, 3H)
    qkv = qkv.reshape(B, S, 3 * H)
    q = qkv[:, 0:1, 0:H]            # (B, 1, H)  CLS query row only
    k = qkv[:, :, H:2 * H]          # (B, S, H)
    v = qkv[:, :, 2 * H:3 * H]      # (B, S, H)

    # ---- masked single-head attention for the CLS row ----
    s = jnp.einsum('bqd,bkd->bqk', q, k,
                   preferred_element_type=jnp.float32) * scale         # (B, 1, S)
    s = s + maskbias_ref[...]
    s = s - jnp.max(s, axis=-1, keepdims=True)
    p = jnp.exp(s)
    p = p * pl.reciprocal(jnp.sum(p, axis=-1, keepdims=True), approx=True)
    ctx = jnp.einsum('bqk,bkd->bqd', p, v,
                     preferred_element_type=jnp.float32)                # (B, 1, H)
    ctx = ctx[:, 0, :]                                                  # (B, H)

    attn = jnp.dot(ctx.astype(wo_ref.dtype), wo_ref[...],
                   preferred_element_type=jnp.float32) + bo_ref[...]    # (B, H)
    cls = xcls_ref[...].astype(jnp.float32) + attn                      # residual

    # ---- FFNLayer head: fc1 -> GELU(exact) -> LayerNorm -> fc2 ----
    h = jnp.dot(cls.astype(w1_ref.dtype), w1_ref[...],
                preferred_element_type=jnp.float32) + b1_ref[...]
    h = 0.5 * h * (1.0 + jax.lax.erf(h * (1.0 / math.sqrt(2.0))))       # exact GELU
    mu = jnp.mean(h, axis=-1, keepdims=True)
    var = jnp.mean((h - mu) ** 2, axis=-1, keepdims=True)                # biased var
    hn = (h - mu) * jax.lax.rsqrt(var + 1e-5)
    hn = hn * gamma_ref[...] + beta_ref[...]

    out_ref[...] = jnp.dot(hn.astype(w2_ref.dtype), w2_ref[...],
                           preferred_element_type=jnp.float32) + b2_ref[...]


# ------------------------------ JAX wrapper ---------------------------------

def classifier_forward(data, params, num_classes):
    """ClassifierModel.forward: backbone -> CLS token -> FFN projection."""
    input_ids = data['input_ids']
    mask = data['input_mask'].astype(jnp.float32)

    # Embedding lookup (glue, plain XLA).
    x = jnp.take(params['emb'], input_ids, axis=0).astype(jnp.bfloat16)  # (B, S, H)
    B, S, H = x.shape

    # Layout plumbing in the wrapper (cheap): flatten tokens, pick CLS rows.
    x2d = x.reshape(B * S, H)
    x_cls = x[:, 0, :]

    # Additive attention-mask bias: 0 where attended, -1e9 where padded.
    mask_bias = (1.0 - mask)[:, None, :] * jnp.float32(-1e9)             # (B, 1, S)

    Cp = params['w2'].shape[1]                                           # padded 128
    vmem = pl.BlockSpec(memory_space=pltpu.MemorySpace.VMEM)

    logits_padded = pl.pallas_call(
        _classifier_kernel,
        out_shape=jax.ShapeDtypeStruct((B, Cp), jnp.float32),
        in_specs=[vmem] * 13,
        out_specs=vmem,
    )(x2d, x_cls, mask_bias,
      params['wqkv'], params['bqkv'], params['wo'], params['bo'],
      params['w1'], params['b1'], params['gamma'], params['beta'],
      params['w2'], params['b2'])

    # torch `.squeeze(-1)` is a no-op since num_classes (4) > 1.
    return logits_padded[:, :num_classes]


# ---------------------------- parameter set-up ------------------------------

def init_params(key, vocab_size, hidden, num_classes, padded_classes=128):
    ks = jax.random.split(key, 8)
    scale = 0.02

    def w(k, shape):
        return jax.random.normal(k, shape, jnp.float32) * scale

    wq = w(ks[1], (hidden, hidden))
    wk = w(ks[2], (hidden, hidden))
    wv = w(ks[3], (hidden, hidden))
    wqkv = jnp.concatenate([wq, wk, wv], axis=1).astype(jnp.bfloat16)    # (H, 3H)

    w2 = w(ks[7], (hidden, num_classes))
    w2p = (jnp.zeros((hidden, padded_classes), jnp.float32)
           .at[:, :num_classes].set(w2)).astype(jnp.bfloat16)            # lane-dense
    b2p = jnp.zeros((1, padded_classes), jnp.float32)

    return {
        # synthetic backbone
        'emb': w(ks[0], (vocab_size, hidden)),
        'wqkv': wqkv,
        'bqkv': jnp.zeros((1, 3 * hidden), jnp.float32),
        'wo': w(ks[4], (hidden, hidden)).astype(jnp.bfloat16),
        'bo': jnp.zeros((1, hidden), jnp.float32),
        # FFNLayer projection head
        'w1': w(ks[5], (hidden, hidden)).astype(jnp.bfloat16),
        'b1': jax.random.normal(ks[6], (1, hidden), jnp.float32) * scale,
        'gamma': jnp.ones((1, hidden), jnp.float32),    # nn.LayerNorm init
        'beta': jnp.zeros((1, hidden), jnp.float32),
        'w2': w2p,
        'b2': b2p,
    }


# ---------------------------------- main -------------------------------------

if __name__ == "__main__":
    B, S, H, V, C = 2, 8, 32, 50, 4

    key = jax.random.PRNGKey(0)
    pkey, ikey = jax.random.split(key)
    params = init_params(pkey, V, H, C)

    input_ids = jax.random.randint(ikey, (B, S), 0, V, dtype=jnp.int32)
    input_mask = jnp.ones((B, S), jnp.int32).at[1, 6:].set(0)   # pad tail of row 1
    data = {'input_ids': input_ids, 'input_mask': input_mask}

    probs = classifier_forward(data, params, C)
    probs = jax.block_until_ready(probs)

    assert probs.shape == (B, C), probs.shape
    assert bool(jnp.all(jnp.isfinite(probs)))
    print("KERNEL_OK")
</pallas_src>

<mosaic_0001>
module attributes {stable_mosaic.version = 11 : i64} {
  func.func @_classifier_kernel(%arg0: memref<16x32xbf16, #tpu.memory_space<vmem>>, %arg1: memref<2x32xbf16, #tpu.memory_space<vmem>>, %arg2: memref<2x1x8xf32, #tpu.memory_space<vmem>>, %arg3: memref<32x96xbf16, #tpu.memory_space<vmem>>, %arg4: memref<1x96xf32, #tpu.memory_space<vmem>>, %arg5: memref<32x32xbf16, #tpu.memory_space<vmem>>, %arg6: memref<1x32xf32, #tpu.memory_space<vmem>>, %arg7: memref<32x32xbf16, #tpu.memory_space<vmem>>, %arg8: memref<1x32xf32, #tpu.memory_space<vmem>>, %arg9: memref<1x32xf32, #tpu.memory_space<vmem>>, %arg10: memref<1x32xf32, #tpu.memory_space<vmem>>, %arg11: memref<32x128xbf16, #tpu.memory_space<vmem>>, %arg12: memref<1x128xf32, #tpu.memory_space<vmem>>, %arg13: memref<2x128xf32, #tpu.memory_space<vmem>>) attributes {dimension_semantics = [], scalar_prefetch = 0 : i64, scratch_operands = 0 : i64, tpu.core_type = #tpu.core_type<tc>} {
    %c0 = arith.constant 0 : index
    %c0_0 = arith.constant 0 : index
    %0 = vector.load %arg0[%c0, %c0_0] : memref<16x32xbf16, #tpu.memory_space<vmem>>, vector<16x32xbf16>
    %c0_1 = arith.constant 0 : index
    %c0_2 = arith.constant 0 : index
    %1 = vector.load %arg3[%c0_1, %c0_2] : memref<32x96xbf16, #tpu.memory_space<vmem>>, vector<32x96xbf16>
    %cst = arith.constant dense<0.000000e+00> : vector<16x96xf32>
    %2 = tpu.matmul %0, %1, %cst {dimension_numbers = #tpu.dot_dimension_numbers<[1], [0], [0], [1], [0, 0, 1, 1], [], []>} : vector<16x32xbf16>, vector<32x96xbf16>, vector<16x96xf32> -> vector<16x96xf32>
    %c0_3 = arith.constant 0 : index
    %c0_4 = arith.constant 0 : index
    %3 = vector.load %arg4[%c0_3, %c0_4] : memref<1x96xf32, #tpu.memory_space<vmem>>, vector<1x96xf32>
    %4 = vector.broadcast %3 : vector<1x96xf32> to vector<16x96xf32>
    %5 = arith.addf %2, %4 : vector<16x96xf32>
    %6 = vector.shape_cast %5 : vector<16x96xf32> to vector<2x8x96xf32>
    %7 = vector.extract_strided_slice %6 {offsets = [0, 0, 0], sizes = [2, 1, 32], strides = [1, 1, 1]} : vector<2x8x96xf32> to vector<2x1x32xf32>
    %8 = vector.extract_strided_slice %6 {offsets = [0, 0, 32], sizes = [2, 8, 32], strides = [1, 1, 1]} : vector<2x8x96xf32> to vector<2x8x32xf32>
    %9 = vector.extract_strided_slice %6 {offsets = [0, 0, 64], sizes = [2, 8, 32], strides = [1, 1, 1]} : vector<2x8x96xf32> to vector<2x8x32xf32>
    "tpu.trace_start"() <{level = 10 : i32, message = "bqd,bkd->bqk"}> : () -> ()
    %cst_5 = arith.constant dense<0.000000e+00> : vector<2x1x8xf32>
    %10 = tpu.matmul %7, %8, %cst_5 {dimension_numbers = #tpu.dot_dimension_numbers<[2], [2], [1], [1], [0, 0, 0, 1, 1, 1], [0], [0]>} : vector<2x1x32xf32>, vector<2x8x32xf32>, vector<2x1x8xf32> -> vector<2x1x8xf32>
    "tpu.trace_stop"() : () -> ()
    %cst_6 = arith.constant 0.176776692 : f32
    %11 = vector.broadcast %cst_6 : f32 to vector<2x1x8xf32>
    %12 = arith.mulf %10, %11 : vector<2x1x8xf32>
    %c0_7 = arith.constant 0 : index
    %c0_8 = arith.constant 0 : index
    %c0_9 = arith.constant 0 : index
    %13 = vector.load %arg2[%c0_7, %c0_8, %c0_9] : memref<2x1x8xf32, #tpu.memory_space<vmem>>, vector<2x1x8xf32>
    %14 = arith.addf %12, %13 : vector<2x1x8xf32>
    %cst_10 = arith.constant dense<0xFF800000> : vector<2x1xf32>
    %15 = vector.multi_reduction <maximumf>, %14, %cst_10 [2] : vector<2x1x8xf32> to vector<2x1xf32>
    %16 = vector.shape_cast %15 : vector<2x1xf32> to vector<2x1x1xf32>
    %17 = vector.broadcast %16 : vector<2x1x1xf32> to vector<2x1x8xf32>
    %18 = arith.subf %14, %17 : vector<2x1x8xf32>
    %19 = math.exp %18 : vector<2x1x8xf32>
    %cst_11 = arith.constant dense<0.000000e+00> : vector<2x1xf32>
    %20 = vector.multi_reduction <add>, %19, %cst_11 [2] : vector<2x1x8xf32> to vector<2x1xf32>
    %21 = vector.shape_cast %20 : vector<2x1xf32> to vector<2x1x1xf32>
    %22 = tpu.reciprocal %21 {approx = true} : vector<2x1x1xf32> -> vector<2x1x1xf32>
    %23 = vector.broadcast %22 : vector<2x1x1xf32> to vector<2x1x8xf32>
    %24 = arith.mulf %19, %23 : vector<2x1x8xf32>
    "tpu.trace_start"() <{level = 10 : i32, message = "bqk,bkd->bqd"}> : () -> ()
    %cst_12 = arith.constant dense<0.000000e+00> : vector<2x1x32xf32>
    %25 = tpu.matmul %24, %9, %cst_12 {dimension_numbers = #tpu.dot_dimension_numbers<[2], [1], [1], [2], [0, 0, 0, 1, 1, 2], [0], [0]>} : vector<2x1x8xf32>, vector<2x8x32xf32>, vector<2x1x32xf32> -> vector<2x1x32xf32>
    "tpu.trace_stop"() : () -> ()
    %26 = vector.shape_cast %25 : vector<2x1x32xf32> to vector<2x32xf32>
    %27 = arith.truncf %26 : vector<2x32xf32> to vector<2x32xbf16>
    %c0_13 = arith.constant 0 : index
    %c0_14 = arith.constant 0 : index
    %28 = vector.load %arg5[%c0_13, %c0_14] : memref<32x32xbf16, #tpu.memory_space<vmem>>, vector<32x32xbf16>
    %cst_15 = arith.constant dense<0.000000e+00> : vector<2x32xf32>
    %29 = tpu.matmul %27, %28, %cst_15 {dimension_numbers = #tpu.dot_dimension_numbers<[1], [0], [0], [1], [0, 0, 1, 1], [], []>} : vector<2x32xbf16>, vector<32x32xbf16>, vector<2x32xf32> -> vector<2x32xf32>
    %c0_16 = arith.constant 0 : index
    %c0_17 = arith.constant 0 : index
    %30 = vector.load %arg6[%c0_16, %c0_17] : memref<1x32xf32, #tpu.memory_space<vmem>>, vector<1x32xf32>
    %31 = vector.broadcast %30 : vector<1x32xf32> to vector<2x32xf32>
    %32 = arith.addf %29, %31 : vector<2x32xf32>
    %c0_18 = arith.constant 0 : index
    %c0_19 = arith.constant 0 : index
    %33 = vector.load %arg1[%c0_18, %c0_19] : memref<2x32xbf16, #tpu.memory_space<vmem>>, vector<2x32xbf16>
    %34 = arith.extf %33 : vector<2x32xbf16> to vector<2x32xf32>
    %35 = arith.addf %34, %32 : vector<2x32xf32>
    %36 = arith.truncf %35 : vector<2x32xf32> to vector<2x32xbf16>
    %c0_20 = arith.constant 0 : index
    %c0_21 = arith.constant 0 : index
    %37 = vector.load %arg7[%c0_20, %c0_21] : memref<32x32xbf16, #tpu.memory_space<vmem>>, vector<32x32xbf16>
    %cst_22 = arith.constant dense<0.000000e+00> : vector<2x32xf32>
    %38 = tpu.matmul %36, %37, %cst_22 {dimension_numbers = #tpu.dot_dimension_numbers<[1], [0], [0], [1], [0, 0, 1, 1], [], []>} : vector<2x32xbf16>, vector<32x32xbf16>, vector<2x32xf32> -> vector<2x32xf32>
    %c0_23 = arith.constant 0 : index
    %c0_24 = arith.constant 0 : index
    %39 = vector.load %arg8[%c0_23, %c0_24] : memref<1x32xf32, #tpu.memory_space<vmem>>, vector<1x32xf32>
    %40 = vector.broadcast %39 : vector<1x32xf32> to vector<2x32xf32>
    %41 = arith.addf %38, %40 : vector<2x32xf32>
    %cst_25 = arith.constant 5.000000e-01 : f32
    %42 = vector.broadcast %cst_25 : f32 to vector<2x32xf32>
    %43 = arith.mulf %42, %41 : vector<2x32xf32>
    %cst_26 = arith.constant 0.707106769 : f32
    %44 = vector.broadcast %cst_26 : f32 to vector<2x32xf32>
    %45 = arith.mulf %41, %44 : vector<2x32xf32>
    %46 = math.erf %45 : vector<2x32xf32>
    %cst_27 = arith.constant 1.000000e+00 : f32
    %47 = vector.broadcast %cst_27 : f32 to vector<2x32xf32>
    %48 = arith.addf %47, %46 : vector<2x32xf32>
    %49 = arith.mulf %43, %48 : vector<2x32xf32>
    %cst_28 = arith.constant dense<0.000000e+00> : vector<2xf32>
    %50 = vector.multi_reduction <add>, %49, %cst_28 [1] : vector<2x32xf32> to vector<2xf32>
    %51 = vector.shape_cast %50 : vector<2xf32> to vector<2x1xf32>
    %cst_29 = arith.constant 3.200000e+01 : f32
    %52 = vector.broadcast %cst_29 : f32 to vector<2x1xf32>
    %53 = arith.divf %51, %52 : vector<2x1xf32>
    %54 = vector.broadcast %53 : vector<2x1xf32> to vector<2x32xf32>
    %55 = arith.subf %49, %54 : vector<2x32xf32>
    %56 = arith.mulf %55, %55 : vector<2x32xf32>
    %cst_30 = arith.constant dense<0.000000e+00> : vector<2xf32>
    %57 = vector.multi_reduction <add>, %56, %cst_30 [1] : vector<2x32xf32> to vector<2xf32>
    %58 = vector.shape_cast %57 : vector<2xf32> to vector<2x1xf32>
    %cst_31 = arith.constant 3.200000e+01 : f32
    %59 = vector.broadcast %cst_31 : f32 to vector<2x1xf32>
    %60 = arith.divf %58, %59 : vector<2x1xf32>
    %61 = vector.broadcast %53 : vector<2x1xf32> to vector<2x32xf32>
    %62 = arith.subf %49, %61 : vector<2x32xf32>
    %cst_32 = arith.constant 9.99999974E-6 : f32
    %63 = vector.broadcast %cst_32 : f32 to vector<2x1xf32>
    %64 = arith.addf %60, %63 : vector<2x1xf32>
    %65 = math.rsqrt %64 : vector<2x1xf32>
    %66 = vector.broadcast %65 : vector<2x1xf32> to vector<2x32xf32>
    %67 = arith.mulf %62, %66 : vector<2x32xf32>
    %c0_33 = arith.constant 0 : index
    %c0_34 = arith.constant 0 : index
    %68 = vector.load %arg9[%c0_33, %c0_34] : memref<1x32xf32, #tpu.memory_space<vmem>>, vector<1x32xf32>
    %69 = vector.broadcast %68 : vector<1x32xf32> to vector<2x32xf32>
    %70 = arith.mulf %67, %69 : vector<2x32xf32>
    %c0_35 = arith.constant 0 : index
    %c0_36 = arith.constant 0 : index
    %71 = vector.load %arg10[%c0_35, %c0_36] : memref<1x32xf32, #tpu.memory_space<vmem>>, vector<1x32xf32>
    %72 = vector.broadcast %71 : vector<1x32xf32> to vector<2x32xf32>
    %73 = arith.addf %70, %72 : vector<2x32xf32>
    %74 = arith.truncf %73 : vector<2x32xf32> to vector<2x32xbf16>
    %c0_37 = arith.constant 0 : index
    %c0_38 = arith.constant 0 : index
    %75 = vector.load %arg11[%c0_37, %c0_38] : memref<32x128xbf16, #tpu.memory_space<vmem>>, vector<32x128xbf16>
    %cst_39 = arith.constant dense<0.000000e+00> : vector<2x128xf32>
    %76 = tpu.matmul %74, %75, %cst_39 {dimension_numbers = #tpu.dot_dimension_numbers<[1], [0], [0], [1], [0, 0, 1, 1], [], []>} : vector<2x32xbf16>, vector<32x128xbf16>, vector<2x128xf32> -> vector<2x128xf32>
    %c0_40 = arith.constant 0 : index
    %c0_41 = arith.constant 0 : index
    %77 = vector.load %arg12[%c0_40, %c0_41] : memref<1x128xf32, #tpu.memory_space<vmem>>, vector<1x128xf32>
    %78 = vector.broadcast %77 : vector<1x128xf32> to vector<2x128xf32>
    %79 = arith.addf %76, %78 : vector<2x128xf32>
    %c0_42 = arith.constant 0 : index
    %c0_43 = arith.constant 0 : index
    %80 = vector.load %arg13[%c0_42, %c0_43] : memref<2x128xf32, #tpu.memory_space<vmem>>, vector<2x128xf32>
    tpu.vector_store %arg13[%c0_42, %c0_43], %79 {strides = array<i32>} : memref<2x128xf32, #tpu.memory_space<vmem>>, vector<2x128xf32>,
    return
  }
}

</mosaic_0001>

<bundles_post_ra>
// kernel: tpu_custom_call.1
= control target key start
LH: loop header
LB: loop body
LE: loop exit
PB: predicated region body
PF: predicated region fallthrough
CT: control target
= control target key end

     0   :  { %18 = vsyncpa [#allocation3], 0  ;;  %s1011_s0 = inlined_call_operand.hbm [shape: bf16[16,32], index: 0, kind: input, shape index: {}]   ;;  %s1012_s1 = inlined_call_operand.hbm [shape: bf16[2,32], index: 1, kind: input, shape index: {}]   ;;  %s1013_s2 = inlined_call_operand.hbm [shape: f32[2,1,8], index: 2, kind: input, shape index: {}]   ;;  %s1014_s3 = inlined_call_operand.hbm [shape: bf16[32,96], index: 3, kind: input, shape index: {}]   ;;  %s1015_s4 = inlined_call_operand.vmem [shape: f32[1,96], index: 4, kind: input, shape index: {}]   ;;  %s1016_s5 = inlined_call_operand.hbm [shape: bf16[32,32], index: 5, kind: input, shape index: {}]   ;;  %s1017_s6 = inlined_call_operand.vmem [shape: f32[1,32], index: 6, kind: input, shape index: {}]   ;;  %s1018_s7 = inlined_call_operand.hbm [shape: bf16[32,32], index: 7, kind: input, shape index: {}]   ;;  %s1019_s8 = inlined_call_operand.vmem [shape: f32[1,32], index: 8, kind: input, shape index: {}]   ;;  %s1020_s9 = inlined_call_operand.vmem [shape: f32[1,32], index: 9, kind: input, shape index: {}]   ;;  %s1021_s10 = inlined_call_operand.vmem [shape: f32[1,32], index: 10, kind: input, shape index: {}]   ;;  %s1022_s11 = inlined_call_operand.hbm [shape: bf16[32,128], index: 11, kind: input, shape index: {}]   ;;  %s1023_s12 = inlined_call_operand.vmem [shape: f32[1,128], index: 12, kind: input, shape index: {}]   ;;  %s1024_s13 = inlined_call_operand.hbm [shape: f32[2,128], index: 13, kind: output, shape index: {}]  }
   0x1   :  { %19 = vsyncpa [#allocation6], 0 }
   0x2   :  { %20 = vsyncpa [#allocation9], 0 }
   0x3   :  { %21 = vsyncpa [#allocation12], 0  ;;  %s41_s27 = sshll.u32 %s1012_s1, 4  ;;  %s42_s27 = int_to_ptr.hbm [resolvable:$true] %s41_s27 }
   0x4   :  { %22 = vsyncpa [#allocation4], 0  ;;  %s854_s28 = smov [#allocation5]   ;;  %s64_s15 = sshll.u32 %s1014_s3, 4  ;;  %s65_s15 = int_to_ptr.hbm [resolvable:$true] %s64_s15 }
   0x5   :  { %s43_s29 = sshll.u32 %s854_s28, 4  ;;  %s855_s16 = smov [#allocation8]   ;;  %s44_s29 = int_to_ptr.vmem [resolvable:$true] %s43_s29 }
   0x6   :  { %46 = dma.hbm_to_vmem [thread:$0]  %s42_s27, 16, %s44_s29, [#allocation6]  }
   0x7   :  { %s66_s17 = sshll.u32 %s855_s16, 4  ;;  %s94_s20 = sshll.u32 %s1018_s7, 4  ;;  %s67_s17 = int_to_ptr.vmem [resolvable:$true] %s66_s17  ;;  %s95_s20 = int_to_ptr.hbm [resolvable:$true] %s94_s20 }
   0x8   :  { %s856_s1 = smov 64   ;;  %s857_s21 = smov 4  }
   0x9   :  { %72 = dma.hbm_to_vmem [thread:$0]  %s65_s15, 256, %s67_s17, [#allocation9], %s856_s1, %s856_s1, %s857_s21  }
   0xa   :  { %s27_s24 = sshll.u32 %s1011_s0, 4  ;;  %s858_s3 = smov [#allocation11]   ;;  %s28_s24 = int_to_ptr.hbm [resolvable:$true] %s27_s24 }
   0xb   :  { %s96_s25 = sshll.u32 %s858_s3, 4  ;;  %s859_s7 = smov [#allocation2]   ;;  %s97_s25 = int_to_ptr.vmem [resolvable:$true] %s96_s25 }
   0xc   :  { %102 = dma.hbm_to_vmem [thread:$0]  %s95_s20, 256, %s97_s25, [#allocation12], %s856_s1, %s856_s1, %s857_s21  }
   0xd   :  { %s29_s26 = sshll.u32 %s859_s7, 4  ;;  %s51_s29 = sshll.u32 %s1013_s2, 4  ;;  %s30_s26 = int_to_ptr.vmem [resolvable:$true] %s29_s26  ;;  %s52_s29 = int_to_ptr.hbm [resolvable:$true] %s51_s29 }
   0xe   :  { %35 = dma.hbm_to_vmem [thread:$0]  %s28_s24, 128, %s30_s26, [#allocation3], %s856_s1, %s856_s1, %s857_s21  }
   0xf   :  { %s860_s0 = smov [#allocation7]   ;;  %s79_s16 = sshll.u32 %s1016_s5, 4  ;;  %s80_s16 = int_to_ptr.hbm [resolvable:$true] %s79_s16 }
  0x10   :  { %s53_s30 = sshll.u32 %s860_s0, 4  ;;  %s861_s17 = smov 16   ;;  %s54_s30 = int_to_ptr.vmem [resolvable:$true] %s53_s30 }
  0x11   :  { %s862_s18 = smov 1   ;;  %s863_s19 = smov [#allocation10]  }
  0x12   :  { %59 = dma.hbm_to_vmem [thread:$0]  %s52_s29, 32, %s54_s30, [#allocation6], %s861_s17, %s861_s17, %s862_s18  }
  0x13   :  { %s81_s20 = sshll.u32 %s863_s19, 4  ;;  %s113_s23 = sshll.u32 %s1022_s11, 4  ;;  %s82_s20 = int_to_ptr.vmem [resolvable:$true] %s81_s20  ;;  %s114_s23 = int_to_ptr.hbm [resolvable:$true] %s113_s23 }
  0x14   :  { %87 = dma.hbm_to_vmem [thread:$0]  %s80_s16, 256, %s82_s20, [#allocation9], %s856_s1, %s856_s1, %s857_s21  }
  0x15   :  { %s864_s24 = smov [#allocation13]  }
  0x16   :  { %s115_s3 = sshll.u32 %s864_s24, 4  ;;  %s116_s3 = int_to_ptr.vmem [resolvable:$true] %s115_s3 }
  0x17   :  { %121 = dma.hbm_to_vmem [thread:$0]  %s114_s23, 256, %s116_s3, [#allocation12], %s856_s1, %s856_s1, %s857_s21  }
  0x18   :  { %844 = dma.done.wait [#allocation3], 128  }
  0x19   :  { %845 = vsyncadd [#allocation3], 4294967168 }
  0x1a   :  { %846 = dma.done.wait [#allocation6], 48  }
  0x1b   :  { %847 = vsyncadd [#allocation6], 4294967248 }
  0x1c   :  { %848 = dma.done.wait [#allocation9], 512  }
  0x1d   :  { %849 = vsyncadd [#allocation9], 4294966784 }
  0x1e   :  { %850 = dma.done.wait [#allocation12], 512  }
  0x1f   :  { %851 = vsyncadd [#allocation12], 4294966784  ;;  %v611_v0 = vld [vmem:[#allocation8 + $0x8] sm:$0xff]  ;;  %v610_v1 = vld [vmem:[#allocation8] sm:$0xff]  ;;  %vm180_vm0 = vcmask 261120   ;;  %s865_s21 = smov 96  }
  0x20   :  { %190 = vmatpush.bf16.msra.mxu0 %v611_v0  ;;  %v609_v2 = vld [vmem:[#allocation2] sm:$0xff]  ;;  %v255_v12 = vld [vmem:[#allocation7 + $0x1] sm:$0x1]  ;;  %vm258_vm1 = vcmask 57344   ;;  %v254_v18 = vld [vmem:[#allocation7] sm:$0x1] }
  0x21   :  { %v632_v4 = vld [vmem:[%s1015_s4] ss:$0 sm:$0xff]  ;;  %vm284_vm2 = vcmask 64512   ;;  %v613_v38 = vld [vmem:[#allocation10 + $0x8] sm:$0xff]  ;;  %v615_v40 = vld [vmem:[#allocation11 + $0x8] sm:$0xff]  ;;  %vm349_vm3 = vcmask 1041409  }
  0x22   :  { %v612_v39 = vld [vmem:[#allocation10] sm:$0xff]  ;;  %v614_v50 = vld [vmem:[#allocation11] sm:$0xff]  ;;  %v380_v51 = vld [vmem:[#allocation5] sm:$0x1]  ;;  %vm464_vm8 = vcmask 254976   ;;  %s867_s0 = smov [#allocation14]  }
  0x23   :  { %v633_v52 = vld [vmem:[%s1017_s6] ss:$0 sm:$0xff]  ;;  %v381_v53 = vunpack.c.l.bf16 %v380_v51  ;;  %v617_v51 = vld [vmem:[#allocation13 + $0x8] sm:$0xff]  ;;  %s547_s30 = sshll.u32 %s867_s0, 4  ;;  %s548_s30 = int_to_ptr.vmem [resolvable:$true] %s547_s30 }
  0x24   :  { %191 = vmatpush.bf16.msra.mxu0 %v610_v1  ;;  %v634_v59 = vld [vmem:[%s1019_s8] ss:$0 sm:$0xff] }
  0x27   :  { %574 = vmatmul.msk.bf16.vlgmr.msra.gmra.mxu0 %vm180_vm0, %v609_v2 }
  0xa4   :  { %v193_v3 = vpop.f32.mrf.mxu0 }
  0xa5   :  { %v194_v7 = vadd.f32 %v632_v4, %v193_v3 }
  0xac   :  { %v195_v5 = vpop.f32.mrf.mxu0 }
  0xad   :  { %v196_v6 = vadd.f32 %v632_v4, %v195_v5 }
  0xaf   :  { %226 = vrot.lane.b32.xlu0 %v196_v6, %s865_s21 }
  0xb7   :  { %199 = vrot.lane.b32.xlu0 %v194_v7, %s865_s21 }
  0xbf   :  { %308 = vrot.lane.b32.xlu0 %v196_v6, %s856_s1 }
 0x121   :  { %v227_v8 = vpop.permute.xlu0 %226 }
 0x122   :  { %577 = vmatpush.xpose.msk.msra.mxu2 %vm180_vm0, %v227_v8 }
 0x125   :  { %578 = vmatmul.msk.f32.vlgmr.msra.gmra.mxu2 %vm180_vm0, %v196_v6 }
 0x126   :  { %413 = vmatpush.bf16.msrb.mxu2 %v615_v40 }
 0x129   :  { %v200_v9 = vpop.permute.xlu0 %199 }
 0x12a   :  { %575 = vmatpush.xpose.msk.msra.mxu1 %vm180_vm0, %v200_v9  ;;  %414 = vmatpush.bf16.msrb.mxu2 %v614_v50 }
 0x12d   :  { %576 = vmatmul.msk.f32.vlgmr.msra.gmra.mxu1 %vm180_vm0, %v194_v7 }
 0x12e   :  { %373 = vmatpush.bf16.msrb.mxu1 %v613_v38 }
 0x131   :  { %v309_v10 = vpop.permute.xlu0 %308 }
 0x132   :  { %329 = vmatpush.msra.mxu3 %v309_v10  ;;  %374 = vmatpush.bf16.msrb.mxu1 %v612_v39  ;;  %v866_v39 = vmov 32.0  }
 0x134   :  { %534 = vmatpush.bf16.msrb.mxu3 %v617_v51 }
 0x1a8   :  { %v249_v11 = vpop.f32.mrf.mxu2 }
 0x1a9   :  { %v253_v13 = vmul.f32 0.17677669, %v249_v11 }
 0x1aa   :  { %v222_v14 = vpop.f32.mrf.mxu1 }
 0x1ab   :  { %v257_v15 = vadd.f32 %v255_v12, %v253_v13  ;;  %v252_v16 = vmul.f32 0.17677669, %v222_v14 }
 0x1ad   :  { %v262_v17 = vsel %vm258_vm1, %v257_v15, -inf  ;;  %v256_v19 = vadd.f32 %v254_v18, %v252_v16 }
 0x1ae   :  { %263 = vmax.xlane.f32.xlu1 %v262_v17 }
 0x1af   :  { %v259_v20 = vsel %vm258_vm1, %v256_v19, -inf }
 0x1b6   :  { %260 = vmax.xlane.f32.xlu1 %v259_v20 }
 0x1cf   :  { %281 = vrot.lane.b32.xlu1 %v194_v7, %s856_s1 }
 0x221   :  { %v264_v21 = vpop.xlane.xlu1 %263 }
 0x222   :  { %v266_v22 = vsub.f32 %v257_v15, %v264_v21 }
 0x224   :  { %v269_v23 = vmul.f32 1.442695, %v266_v22 }
 0x226   :  { %638 = vpow2.f32 %v269_v23 }
 0x229   :  { %v261_v24 = vpop.xlane.xlu1 %260 }
 0x22a   :  { %v265_v25 = vsub.f32 %v256_v19, %v261_v24 }
 0x22c   :  { %v639_v26 = vpop.eup %638  ;;  %v267_v27 = vmul.f32 1.442695, %v265_v25 }
 0x22d   :  { %v274_v28 = vsel %vm258_vm1, %v639_v26, 0.0 }
 0x22e   :  { %640 = vpow2.f32 %v267_v27  ;;  %275 = vadd.xlane.f32.xlu2 %v274_v28 }
 0x234   :  { %v641_v29 = vpop.eup %640 }
 0x235   :  { %v271_v30 = vsel %vm258_vm1, %v641_v29, 0.0 }
 0x236   :  { %272 = vadd.xlane.f32.xlu2 %v271_v30 }
 0x241   :  { %v282_v31 = vpop.permute.xlu1 %281 }
 0x242   :  { %303 = vmatpush.msrb.mxu0 %v282_v31 }
 0x2a1   :  { %v276_v32 = vpop.xlane.xlu2 %275 }
 0x2a2   :  { %642 = vrcp.f32 %v276_v32 }
 0x2a8   :  { %v643_v33 = vpop.eup %642 }
 0x2a9   :  { %v273_v34 = vpop.xlane.xlu2 %272  ;;  %v280_v35 = vmul.f32 %v643_v33, %v639_v26 }
 0x2aa   :  { %644 = vrcp.f32 %v273_v34 }
 0x2ab   :  { %580 = vmatmul.msk.f32.vlgmr.msra.gmra.mxu3 %vm284_vm2, %v280_v35 }
 0x2b0   :  { %v645_v36 = vpop.eup %644 }
 0x2b1   :  { %v279_v37 = vmul.f32 %v645_v36, %v641_v29 }
 0x2b3   :  { %579 = vmatmul.msk.f32.vlgmr.msrb.gmra.mxu0 %vm284_vm2, %v279_v37 }
 0x32e   :  { %v331_v41 = vpop.f32.mrf.mxu3 }
 0x32f   :  { %v335_v42 = vpack.c.bf16 %v331_v41, %v331_v41 }
 0x330   :  { %v305_v43 = vpop.f32.mrf.mxu0 }
 0x331   :  { %v347_v44 = vunpack.c.l.b16 %v335_v42  ;;  %v334_v45 = vpack.c.bf16 %v305_v43, %v305_v43 }
 0x333   :  { %v348_v46 = vrot.slane %v347_v44, 7  ;;  %v346_v47 = vunpack.c.l.b16 %v334_v45 }
 0x335   :  { %v350_v48 = vsel %vm349_vm3, %v348_v46, %v346_v47 }
 0x336   :  { %v351_v49 = vpack.c.b16 %v350_v48, %v350_v48 }
 0x338   :  { %589 = vmatmul.msk.bf16.vlgmr.msrb.gmra.mxu1 %vm180_vm0, %v351_v49 }
 0x3b5   :  { %v376_v54 = vpop.f32.mrf.mxu1 }
 0x3b6   :  { %v377_v55 = vadd.f32 %v633_v52, %v376_v54  ;;  %v616_v52 = vld [vmem:[#allocation13] sm:$0xff] }
 0x3b7   :  { %535 = vmatpush.bf16.msrb.mxu3 %v616_v52 }
 0x3b8   :  { %v382_v56 = vadd.f32 %v381_v53, %v377_v55 }
 0x3ba   :  { %v383_v57 = vpack.c.bf16 %v382_v56, %v382_v56 }
 0x3bc   :  { %598 = vmatmul.msk.bf16.vlgmr.msrb.gmra.mxu2 %vm180_vm0, %v383_v57 }
 0x3bd   :  { %v378_v58 = vpop.f32.mrf.mxu1 }
 0x43f   :  { %v416_v60 = vpop.f32.mrf.mxu2 }
 0x440   :  { %v417_v61 = vadd.f32 %v634_v59, %v416_v60 }
 0x442   :  { %v421_v62 = vmul.f32 0.70710677, %v417_v61  ;;  %v420_v35 = vmul.f32 0.5, %v417_v61 }
 0x444   :  { %v422_v63 = vmul.f32 %v421_v62, %v421_v62 }
 0x446   :  { %v423_v0 = vmin.f32 %v422_v63, 16.0 }
 0x447   :  { %v418_v1 = vpop.f32.mrf.mxu2 }
 0x448   :  { %v424_v2 = vmul.f32 2.1237322e-06, %v423_v0  ;;  %v435_v3 = vmul.f32 3.8918573e-05, %v423_v0  ;;  %v636_v1 = vld [vmem:[%s1021_s10] ss:$0 sm:$0xff] }
 0x44a   :  { %v425_v4 = vadd.f32 0.00028619796, %v424_v2  ;;  %v436_v5 = vadd.f32 0.001143296, %v435_v3 }
 0x44c   :  { %v426_v6 = vmul.f32 %v425_v4, %v423_v0  ;;  %v437_v7 = vmul.f32 %v436_v5, %v423_v0  ;;  %v637_v5 = vld [vmem:[%s1023_s12] ss:$0 sm:$0xff] }
 0x44e   :  { %v438_v8 = vadd.f32 0.014752088, %v437_v7  ;;  %v427_v9 = vadd.f32 0.0036580483, %v426_v6 }
 0x450   :  { %v439_v10 = vmul.f32 %v438_v8, %v423_v0  ;;  %v428_v12 = vmul.f32 %v427_v9, %v423_v0 }
 0x452   :  { %v440_v11 = vadd.f32 0.112945676, %v439_v10  ;;  %v429_v15 = vadd.f32 0.05243302, %v428_v12 }
 0x454   :  { %v441_v13 = vmul.f32 %v440_v11, %v423_v0  ;;  %v430_v18 = vmul.f32 %v429_v15, %v423_v0 }
 0x456   :  { %v442_v14 = vadd.f32 0.4994258, %v441_v13  ;;  %v431_v19 = vadd.f32 0.18741608, %v430_v18 }
 0x458   :  { %v443_v16 = vmul.f32 %v442_v14, %v423_v0  ;;  %v432_v21 = vmul.f32 %v431_v19, %v423_v0 }
 0x45a   :  { %v444_v17 = vadd.f32 1.0, %v443_v16  ;;  %v433_v25 = vadd.f32 1.1283791, %v432_v21 }
 0x45c   :  { %646 = vrcp.f32 %v444_v17  ;;  %v456_v24 = vand.u32 2147483648, %v444_v17  ;;  %v454_v27 = vand.u32 2147483647, %v444_v17  ;;  %vm450_vm5 = vweird.f32 %v444_v17 }
 0x45d   :  { %v434_v30 = vmul.f32 %v433_v25, %v421_v62  ;;  %648 = vrcp.f32 %v866_v39  ;;  %v635_v62 = vld [vmem:[%s1020_s9] ss:$0 sm:$0xff]  ;;  %s549_s9 = sshll.u32 %s1024_s13, 4  ;;  %s550_s9 = int_to_ptr.hbm [resolvable:$true] %s549_s9 }
 0x45e   :  { %v457_v29 = vor.u32 1.1754944e-38, %v456_v24  ;;  %vm455_vm7 = vcmp.eq.f32.partialorder %v454_v27, 8.507059e+37 }
 0x462   :  { %v647_v20 = vpop.eup %646 }
 0x463   :  { %v446_v22 = vmul.f32 %v647_v20, %v444_v17  ;;  %vm451_vm4 = vweird.f32 %v647_v20  ;;  %v649_v40 = vpop.eup %648 }
 0x464   :  { %vm452_vm6 = vmor %vm450_vm5, %vm451_vm4  ;;  %v469_v41 = vmul.f32 32.0, %v649_v40  ;;  %vm473_vm9 = vweird.f32 %v649_v40 }
 0x465   :  { %v447_v23 = vsub.f32 1.0, %v446_v22 }
 0x466   :  { %v470_v42 = vsub.f32 1.0, %v469_v41 }
 0x467   :  { %v448_v26 = vmul.f32 %v647_v20, %v447_v23 }
 0x468   :  { %v471_v43 = vmul.f32 %v649_v40, %v470_v42 }
 0x469   :  { %v449_v28 = vadd.f32 %v647_v20, %v448_v26 }
 0x46a   :  { %v472_v44 = vadd.f32 %v649_v40, %v471_v43 }
 0x46b   :  { %v453_v31 = vsel %vm452_vm6, %v647_v20, %v449_v28 }
 0x46c   :  { %v458_v32 = vsel %vm455_vm7, %v457_v29, %v453_v31  ;;  %v474_v45 = vsel %vm473_vm9, %v649_v40, %v472_v44 }
 0x46d   :  { %v459_v33 = vmul.f32 %v458_v32, %v434_v30 }
 0x46f   :  { %v599_v34 = vclamps-f32 %v459_v33, 1.0 }
 0x471   :  { %v462_v36 = vadd.f32 1.0, %v599_v34 }
 0x473   :  { %v463_v37 = vmul.f32 %v462_v36, %v420_v35 }
 0x475   :  { %v465_v38 = vsel %vm464_vm8, %v463_v37, 0.0 }
 0x476   :  { %466 = vadd.xlane.f32.xlu2 %v465_v38 }
 0x4e9   :  { %v467_v46 = vpop.xlane.xlu2 %466 }
 0x4ea   :  { %v475_v47 = vmul.f32 %v474_v45, %v467_v46 }
 0x4ec   :  { %v476_v48 = vsub.f32 %v463_v37, %v475_v47 }
 0x4ee   :  { %v477_v49 = vmul.f32 %v476_v48, %v476_v48 }
 0x4f0   :  { %v478_v50 = vsel %vm464_vm8, %v477_v49, 0.0 }
 0x4f1   :  { %479 = vadd.xlane.f32.xlu0 %v478_v50 }
 0x564   :  { %v480_v53 = vpop.xlane.xlu0 %479 }
 0x565   :  { %v481_v54 = vmul.f32 %v480_v53, %v474_v45 }
 0x567   :  { %v482_v55 = vadd.f32 1e-05, %v481_v54 }
 0x569   :  { %650 = vrsqrt.f32 %v482_v55  ;;  %vm489_vm11 = vweird.f32 %v482_v55 }
 0x56f   :  { %v651_v56 = vpop.eup %650 }
 0x570   :  { %v484_v57 = vmul.f32 %v651_v56, %v482_v55  ;;  %vm490_vm10 = vweird.f32 %v651_v56 }
 0x571   :  { %vm491_vm12 = vmor %vm489_vm11, %vm490_vm10 }
 0x572   :  { %v485_v58 = vmul.f32 %v651_v56, %v484_v57 }
 0x574   :  { %v486_v59 = vmul.f32 0.5, %v485_v58 }
 0x576   :  { %v487_v60 = vsub.f32 1.5, %v486_v59 }
 0x578   :  { %v488_v61 = vmul.f32 %v651_v56, %v487_v60 }
 0x57a   :  { %v492_v63 = vsel %vm491_vm12, %v651_v56, %v488_v61 }
 0x57b   :  { %v493_v0 = vmul.f32 %v492_v63, %v476_v48 }
 0x57d   :  { %v498_v2 = vmul.f32 %v635_v62, %v493_v0 }
 0x57f   :  { %v503_v3 = vadd.f32 %v636_v1, %v498_v2 }
 0x581   :  { %v504_v4 = vpack.c.bf16 %v503_v3, %v503_v3 }
 0x583   :  { %608 = vmatmul.msk.bf16.vlgmr.msrb.gmra.mxu3 %vm180_vm0, %v504_v4 }
 0x606   :  { %v537_v6 = vpop.f32.mrf.mxu3 }
 0x607   :  { %v538_v7 = vadd.f32 %v637_v5, %v537_v6 }
 0x609   :  { %541 = vst [vmem:[#allocation14] sm:$0x3] %v538_v7 }
 0x60a   :  { %552 = dma.vmem_to_hbm [thread:$0]  %s548_s30, 32, %s550_s9, [#allocation4]  }
 0x60e   :  { %v539_v8 = vpop.f32.mrf.mxu3 }
 0x60f   :  { %852 = dma.done.wait [#allocation4], 32  }
 0x610   :  { %853 = vsyncadd [#allocation4], 4294967264 }
 0x611   :  { %557 = vsyncpa [#allocation3], 1 }
 0x612   :  { %558 = vsyncpa [#allocation6], 1 }
 0x613   :  { %559 = vsyncpa [#allocation9], 1 }
 0x614   :  { %560 = vsyncpa [#allocation12], 1 }
 0x615   :  { %561 = vsyncpa [#allocation4], 1 }

</bundles_post_ra>
